<compile_context>
chip_gen: v6e
topology: v6e:2x2x1
jax: 0.10.0
libtpu: 0.0.40
codegen_flags: <defaults>
</compile_context>

<pallas_src>
import functools

import jax
import jax.numpy as jnp
from jax.experimental import pallas as pl
from jax.experimental.pallas import tpu as pltpu


def baseline_kernel(p_ref, b_ref, out_ref, acc_ref):
    """One (batch_tile, seq_tile) grid step.

    p_ref:   (TS, TB) VMEM  pre-projected per-token scores (already /seq scaled)
    b_ref:   (1,)     SMEM  fc1 bias
    out_ref: (1, TB)  VMEM  lane-dense sigmoid output for this batch tile
    acc_ref: (1, TB)  VMEM  f32 accumulator, resident across seq steps
    """
    seq_step = pl.program_id(1)

    @pl.when(seq_step == 0)
    def _init():
        acc_ref[...] = jnp.zeros_like(acc_ref)

    # Sublane reduce of the (TS, TB) tile; no per-tile upcast/multiply temps —
    # the kernel stays HBM-DMA-bound.
    acc_ref[...] += jnp.sum(p_ref[...], axis=0, keepdims=True)

    @pl.when(seq_step == pl.num_programs(1) - 1)
    def _finalize():
        out_ref[...] = jax.nn.sigmoid(acc_ref[...] + b_ref[0]).astype(out_ref.dtype)


def _round_up(x, m):
    return (x + m - 1) // m * m


def _pick_tiles(seq, batch, *, buf_budget_bytes=8 << 20, itemsize=4):
    """Pick (seq_tile, batch_tile, padded_seq, padded_batch).

    Batch (lane) tile: full batch if small (full-dim blocks are always legal);
    otherwise 512 lanes per tile so v7x's two TensorCores get >=2 "parallel"
    batch tiles.  Seq (sublane) tile: largest multiple of 8 whose
    double-buffered input block stays under the per-buffer budget
    (conservative for v7x's 64 MiB VMEM; trivially fits v5e/v6e).
    """
    if batch <= 512:
        tb, pb = batch, batch
    else:
        tb = 512
        pb = _round_up(batch, tb)

    max_ts = max(8, (buf_budget_bytes // (tb * itemsize)) // 8 * 8)
    if seq <= max_ts:
        ts, ps = seq, seq
    else:
        ts = max_ts
        ps = _round_up(seq, ts)
    return ts, tb, ps, pb


@functools.partial(jax.jit, static_argnames=("seq_tile", "batch_tile"))
def baseline_forward(x_tokens, emb_table, fc1_w, fc1_b, *,
                     seq_tile=None, batch_tile=None):
    """x_tokens: int32 [seq, batch]; emb_table: [vocab, emb_dim];
    fc1_w: [1, emb_dim]; fc1_b: [1].  Returns [batch] float32."""
    seq, batch = x_tokens.shape
    emb_dim = emb_table.shape[1]

    # --- Projection trick (dominant perf win) -------------------------------
    # sigmoid(mean_s(E[x]) @ W.T + b) == sigmoid(sum_s ((E @ W.T)/seq)[x] + b),
    # so project the whole table to one scalar per vocab entry once and stream
    # only seq*batch scalars through the kernel.
    w_vec = fc1_w.astype(jnp.float32).reshape(emb_dim)
    proj = (emb_table.astype(jnp.float32) @ w_vec) * (1.0 / seq)      # [vocab]
    bias = fc1_b.astype(jnp.float32).reshape(1)

    # TODO(synk): fuse this gather in-kernel (scalar-prefetch token ids +
    # VMEM-resident proj table) to also avoid the tiny [seq, batch] HBM slab.
    projected = jnp.take(proj, x_tokens, axis=0)                      # [seq, batch] f32

    ts, tb, ps, pb = _pick_tiles(seq, batch)
    if seq_tile is not None:
        ts = seq_tile
        ps = _round_up(seq, ts)
    if batch_tile is not None:
        tb = batch_tile
        pb = _round_up(batch, tb)

    if (ps, pb) != (seq, batch):
        # Zero padding: padded seq rows add 0 to the sum; padded batch lanes
        # are computed but sliced off below.
        projected = jnp.pad(projected, ((0, ps - seq), (0, pb - batch)))

    grid = (pb // tb, ps // ts)

    out = pl.pallas_call(
        baseline_kernel,
        out_shape=jax.ShapeDtypeStruct((1, pb), jnp.float32),
        grid_spec=pltpu.PrefetchScalarGridSpec(
            num_scalar_prefetch=0,
            grid=grid,
            in_specs=[
                pl.BlockSpec((ts, tb), lambda i, j: (j, i)),
                pl.BlockSpec(memory_space=pltpu.MemorySpace.SMEM),
            ],
            out_specs=pl.BlockSpec((1, tb), lambda i, j: (0, i)),
            scratch_shapes=[pltpu.VMEM((1, tb), jnp.float32)],
        ),
        compiler_params=pltpu.CompilerParams(
            dimension_semantics=("parallel", "arbitrary"),
            vmem_limit_bytes=48 * 1024 * 1024,
        ),
    )(projected, bias)

    return out[0, :batch]   # (batch,) — mimics torch `.squeeze()`


if __name__ == "__main__":
    # Small deterministic setup consistent with the module.
    vocab_size = 64
    emb_dim = 32
    seq_len = 16
    batch = 2

    key = jax.random.PRNGKey(0)
    k_vec, k_w, k_b, k_x = jax.random.split(key, 4)

    # vocab.vectors equivalent (pretrained embedding table)
    emb_table = jax.random.normal(k_vec, (vocab_size, emb_dim), dtype=jnp.float32)
    # nn.Linear(emb_dim, 1) parameters
    fc1_w = jax.random.normal(k_w, (1, emb_dim), dtype=jnp.float32) * 0.1
    fc1_b = jax.random.normal(k_b, (1,), dtype=jnp.float32) * 0.1
    # token ids, [seq_len, batch]
    x_tokens = jax.random.randint(k_x, (seq_len, batch), 0, vocab_size,
                                  dtype=jnp.int32)

    # seq_tile=8 -> 2 reduction steps over the seq grid axis, exercising the
    # accumulator init / finalize path; auto-tiled path (single step) too.
    y_multi = jax.block_until_ready(
        baseline_forward(x_tokens, emb_table, fc1_w, fc1_b, seq_tile=8))
    y_auto = jax.block_until_ready(
        baseline_forward(x_tokens, emb_table, fc1_w, fc1_b))

    # Pure-JAX reference check (same semantics as the PyTorch forward).
    ref = jax.nn.sigmoid(
        jnp.mean(emb_table[x_tokens], axis=0) @ fc1_w.T + fc1_b
    ).squeeze(-1)
    assert y_multi.shape == (batch,), y_multi.shape
    assert jnp.allclose(y_multi, ref, atol=1e-5), (y_multi, ref)
    assert jnp.allclose(y_auto, ref, atol=1e-5), (y_auto, ref)

    print("KERNEL_OK")
</pallas_src>

<mosaic_0001>
module attributes {stable_mosaic.version = 11 : i64} {
  func.func @baseline_kernel(%arg0: i32, %arg1: i32, %arg2: memref<8x2xf32, #tpu.memory_space<vmem>>, %arg3: memref<1xf32, #tpu.memory_space<smem>>, %arg4: memref<1x2xf32, #tpu.memory_space<vmem>>, %arg5: memref<1x2xf32, #tpu.memory_space<vmem>>) attributes {dimension_semantics = [#tpu.dimension_semantics<parallel>, #tpu.dimension_semantics<arbitrary>], iteration_bounds = array<i64: 1, 2>, scalar_prefetch = 0 : i64, scratch_operands = 1 : i64, tpu.core_type = #tpu.core_type<tc>, window_params = [{transform_indices = @transform_0, window_bounds = array<i64: 8, 2>}, {transform_indices = @transform_1, window_bounds = array<i64: 1>}, {transform_indices = @transform_2, window_bounds = array<i64: 1, 2>}]} {
    %c0_i32 = arith.constant 0 : i32
    %0 = arith.cmpi eq, %arg1, %c0_i32 : i32
    %1 = arith.extui %0 : i1 to i32
    %c0_i32_0 = arith.constant 0 : i32
    %2 = arith.cmpi ne, %1, %c0_i32_0 : i32
    scf.if %2 {
      %cst_7 = arith.constant 0.000000e+00 : f32
      %12 = vector.broadcast %cst_7 : f32 to vector<1x2xf32>
      %c0_8 = arith.constant 0 : index
      %c0_9 = arith.constant 0 : index
      %13 = vector.load %arg5[%c0_8, %c0_9] : memref<1x2xf32, #tpu.memory_space<vmem>>, vector<1x2xf32>
      tpu.vector_store %arg5[%c0_8, %c0_9], %12 {strides = array<i32>} : memref<1x2xf32, #tpu.memory_space<vmem>>, vector<1x2xf32>,
    } else {
    }
    %c0 = arith.constant 0 : index
    %c0_1 = arith.constant 0 : index
    %3 = vector.load %arg5[%c0, %c0_1] : memref<1x2xf32, #tpu.memory_space<vmem>>, vector<1x2xf32>
    %c0_2 = arith.constant 0 : index
    %c0_3 = arith.constant 0 : index
    %4 = vector.load %arg2[%c0_2, %c0_3] : memref<8x2xf32, #tpu.memory_space<vmem>>, vector<8x2xf32>
    %cst = arith.constant dense<0.000000e+00> : vector<2xf32>
    %5 = vector.multi_reduction <add>, %4, %cst [0] : vector<8x2xf32> to vector<2xf32>
    %6 = vector.shape_cast %5 : vector<2xf32> to vector<1x2xf32>
    %7 = arith.addf %3, %6 : vector<1x2xf32>
    %c0_4 = arith.constant 0 : index
    %c0_5 = arith.constant 0 : index
    %8 = vector.load %arg5[%c0_4, %c0_5] : memref<1x2xf32, #tpu.memory_space<vmem>>, vector<1x2xf32>
    tpu.vector_store %arg5[%c0_4, %c0_5], %7 {strides = array<i32>} : memref<1x2xf32, #tpu.memory_space<vmem>>, vector<1x2xf32>,
    %c1_i32 = arith.constant 1 : i32
    %9 = arith.cmpi eq, %arg1, %c1_i32 : i32
    %10 = arith.extui %9 : i1 to i32
    %c0_i32_6 = arith.constant 0 : i32
    %11 = arith.cmpi ne, %10, %c0_i32_6 : i32
    scf.if %11 {
      %c0_7 = arith.constant 0 : index
      %c0_8 = arith.constant 0 : index
      %12 = vector.load %arg5[%c0_7, %c0_8] : memref<1x2xf32, #tpu.memory_space<vmem>>, vector<1x2xf32>
      %c0_9 = arith.constant 0 : index
      %13 = memref.load %arg3[%c0_9] : memref<1xf32, #tpu.memory_space<smem>>
      %14 = vector.broadcast %13 : f32 to vector<1x2xf32>
      %15 = arith.addf %12, %14 : vector<1x2xf32>
      %16 = arith.negf %15 : vector<1x2xf32>
      %17 = math.exp %16 : vector<1x2xf32>
      %cst_10 = arith.constant 1.000000e+00 : f32
      %18 = vector.broadcast %cst_10 : f32 to vector<1x2xf32>
      %19 = arith.addf %18, %17 : vector<1x2xf32>
      %20 = arith.divf %18, %19 : vector<1x2xf32>
      %c0_11 = arith.constant 0 : index
      %c0_12 = arith.constant 0 : index
      %21 = vector.load %arg4[%c0_11, %c0_12] : memref<1x2xf32, #tpu.memory_space<vmem>>, vector<1x2xf32>
      tpu.vector_store %arg4[%c0_11, %c0_12], %20 {strides = array<i32>} : memref<1x2xf32, #tpu.memory_space<vmem>>, vector<1x2xf32>,
    } else {
    }
    return
  }
  func.func @transform_0(%arg0: i32, %arg1: i32) -> (i32, i32) {
    %c0_i32 = arith.constant 0 : i32
    return %arg1, %arg0 : i32, i32
  }
  func.func @transform_1(%arg0: i32, %arg1: i32) -> i32 {
    %c0_i32 = arith.constant 0 : i32
    %c0_i32_0 = arith.constant 0 : i32
    return %c0_i32 : i32
  }
  func.func @transform_2(%arg0: i32, %arg1: i32) -> (i32, i32) {
    %c0_i32 = arith.constant 0 : i32
    %c0_i32_0 = arith.constant 0 : i32
    return %c0_i32, %arg0 : i32, i32
  }
}

</mosaic_0001>

<bundles_post_ra>
// kernel: baseline_forward.1
= control target key start
LH: loop header
LB: loop body
LE: loop exit
PB: predicated region body
PF: predicated region fallthrough
CT: control target
= control target key end

     0   :  { %s426_s0 = inlined_call_operand.vmem [shape: f32[16,2], index: 0, kind: input, shape index: {}]   ;;  %s427_s1 = inlined_call_operand.<no memory space> [shape: f32[1], index: 1, kind: input, shape index: {}]   ;;  %s428_s2 = inlined_call_operand.hbm [shape: f32[1,2], index: 2, kind: output, shape index: {}]  }
   0x1   :  { %7 = sst [smem:[#allocation3]] %s427_s1 }
   0x2   :  { %8 = vsyncpa [#allocation5], 0  ;;  %s372_s11 = smov 0   ;;  %s374_s12 = smov 0  }
   0x3   :  { %s376_s13 = smov 0  }
   0x4 LB: > { %s252_s1 = sadd.s32 4294967295, %s350_s13   ;;  %s23_s14 = sadd.s32 1, %s346_s12  ;;  %s350_s13 = sphi %s376_s13, %s14_s13   ;;  %s346_s12 = sphi %s374_s12, %s431_s12   ;;  %s342_s11 = sphi %s372_s11, %s430_s11  }
   0x5   : > { %p24_p0 = scmp.ge.s32.totalorder %s23_s14, 2  ;;  %p255_p1 = scmp.ge.s32.totalorder %s350_s13, 1 }
   0x6   : > { %p130_p2 = scmp.lt.s32.totalorder %s350_s13, 3 }
   0x7   : > { %s433_s14 = smov (%p24_p0, %s23_s14), 0 }
   0x8   : > { %p131_p3 = pnand %p255_p1, %p130_p2 }
   0x9   : > { %p149_p4 = scmp.lt.s32.totalorder (!%p131_p3), %s342_s11, 1  ;;  %p257_p5 = scmp.ne.s32.totalorder (!%p131_p3), %s342_s11, 0 }
   0xa   : > { %134 = sbr.rel (%p131_p3) target bundleno = 97 (0x61), region = 28 }
   0xf   : > { %s150_s15 = scalar_select %p149_p4, %s342_s11, 1 }
  0x10   : > { %159 = sbr.rel (%p257_p5) target bundleno = 23 (0x17), region = 32 }
  0x11   : > { %s256_s16 = sshll.u32 %s150_s15, 3 }
  0x12   : > { %s155_s19 = scalar_lea.vmem %s426_s0, %s256_s16 }
  0x15   : > { %vm160_vm0 = vcmask 8192   ;;  %v352_v0 = vmov 0.0  }
  0x16   : > { %161 = vst.msk [vmem:[#allocation2] sm:$0x1] %vm160_vm0, %v352_v0 }
  0x17 PF: > { %v163_v1 = vld [vmem:[%s155_s19] sm:$0xff]  ;;  %vm164_vm1 = vcmask 15360   ;;  %vm173_vm2 = vcmask 8192   ;;  %p258_p6 = scmp.ne.s32.totalorder %s342_s11, 1 }
  0x18   : > { %v165_v2 = vsel %vm164_vm1, %v163_v1, 0.0  ;;  %s180_s20 = sld [smem:[#allocation3]] (!%p258_p6) }
  0x19   : > { %v166_v3 = vrot.slane %v165_v2, 4 }
  0x1b   : > { %v167_v4 = vadd.f32 %v166_v3, %v165_v2 }
  0x1d   : > { %v168_v5 = vrot.slane %v167_v4, 2  ;;  %v162_v8 = vld [vmem:[#allocation2] sm:$0x1] }
  0x1f   : > { %v169_v6 = vadd.f32 %v168_v5, %v167_v4 }
  0x21   : > { %v170_v7 = vrot.slane %v169_v6, 1 }
  0x23   : > { %v171_v9 = vadd.f32 %v170_v7, %v169_v6  ;;  %178 = sbr.rel (%p258_p6) target bundleno = 82 (0x52), region = 36 }
  0x25   : > { %v172_v10 = vadd.f32 %v171_v9, %v162_v8 }
  0x27   : > { %174 = vst.msk [vmem:[#allocation2] sm:$0x1] %vm173_vm2, %v172_v10 }
  0x28   : > { %v181_v12 = vstv %s180_s20 }
  0x2e   : > { %v179_v11 = vld [vmem:[#allocation2] sm:$0x1] }
  0x2f   : > { %v182_v13 = vadd.f32 %v181_v12, %v179_v11 }
  0x31   : > { %v259_v14 = vmul.f32 -1.442695, %v182_v13 }
  0x33   : > { %296 = vpow2.f32 %v259_v14 }
  0x40   : > { %v297_v15 = vpop.eup %296 }
  0x41   : > { %v186_v16 = vadd.f32 1.0, %v297_v15 }
  0x43   : > { %298 = vrcp.f32 %v186_v16 }
  0x50   : > { %v299_v17 = vpop.eup %298 }
  0x51   : > { %189 = vst.msk [vmem:[#allocation4] sm:$0x1] %vm173_vm2, %v299_v17 }
  0x52 PF: > { %p402_p7 = scmp.eq.s32.totalorder %s252_s1, 1  ;;  %s353_s22 = smov [#allocation4]  }
  0x53   : > { %s199_s23 = sshll.u32 %s353_s22, 4  ;;  %s200_s23 = int_to_ptr.vmem [resolvable:$true] %s199_s23 }
  0x54   : > { %s300_s24 = scalar_lea.vmem %s200_s23, 16  ;;  %s306_s25 = scalar_lea.vmem %s200_s23, 32 }
  0x55   : > { %p301_p8 = scmp.ne.s32.totalorder %s200_s23, %s300_s24  ;;  %p307_p11 = scmp.lt.s32.totalorder %s200_s23, %s200_s23 }
  0x56   : > { %p308_p12 = scmp.lt.s32.totalorder %s306_s25, %s300_s24 }
  0x57   : > { %p302_p9 = pnand %p301_p8, %p402_p7 }
  0x58   : > { %p309_p13 = por %p308_p12, %p307_p11 }
  0x59   : > { %p303_p10 = pneg %p302_p9 }
  0x5b   : > { %p310_p0 = pnand %p309_p13, %p303_p10 }
  0x5d   : > { %313 = shalt.err (!%p310_p0)
}
  0x5e   : > { %265 = dma.vmem_to_hbm [thread:$0]  (%p402_p7), %s200_s23, 16, %s428_s2, [#allocation5]  }
  0x5f   : > { %337 = dma.done.wait (%p402_p7), [#allocation5], 16  }
  0x60   : > { %339 = vsyncadd (%p402_p7), [#allocation5], 4294967280 }
  0x61 PF: > { %s14_s13 = sadd.s32 1, %s350_s13   ;;  %s430_s11 = smov %s346_s12 }
  0x62   : > { %p11_p1 = scmp.ge.s32.totalorder %s14_s13, 4   ;;  %s431_s12 = smov %s433_s14 }
  0x64   :  { %13 = sbr.rel (!%p11_p1) target bundleno = 4 (0x4), region = 64 }
  0x69   :  { %212 = vsyncpa [#allocation5], 1 }
  0x6a   :  { %214 = vsyncpa [#allocation5 + $0x1], 1 }

</bundles_post_ra>
